<compile_context>
chip_gen: v5e
topology: v5e:2x2
jax: 0.10.0
libtpu: 0.0.40
codegen_flags: <defaults>
</compile_context>

<pallas_src>
import jax
import jax.numpy as jnp
from jax.experimental import pallas as pl
from jax.experimental.pallas import tpu as pltpu

NUM_INPUT = 28 * 28   # 784
NUM_HIDDEN = 64
NUM_CLASSES = 10


def _round_up(x, m):
    return ((x + m - 1) // m) * m


def _mlp_kernel(x_ref, w1_ref, b1_ref, w2_ref, b2_ref, o_ref):
    # Layer 1: Linear(784 -> 64) on the MXU with f32 accumulation, bias + ReLU on the VPU.
    h = jnp.dot(x_ref[...], w1_ref[...], preferred_element_type=jnp.float32)
    h = jnp.maximum(h + b1_ref[...], 0.0)          # (1, 64) bias broadcasts over batch tile
    # Layer 2: Linear(64 -> 10). The masked 10-wide store is hidden behind the
    # dominant x-stream DMA (memory-bound kernel).
    out = jnp.dot(h, w2_ref[...], preferred_element_type=jnp.float32)
    o_ref[...] = (out + b2_ref[...]).astype(o_ref.dtype)


def prepare_params(w1, b1, w2, b2, *, dtype=jnp.float32):
    """One-time parameter preparation (do NOT call per forward).
    w1: (784, 64), b1: (64,), w2: (64, 10), b2: (10,)  [weights stored (in, out)].
    Only w1 (the large matrix) is cast to `dtype`; layer-2 params and biases
    stay f32 since accumulation / bias add / ReLU are done in f32."""
    return (
        jnp.asarray(w1, dtype),                                # (784, 64)
        jnp.asarray(b1, jnp.float32).reshape(1, NUM_HIDDEN),   # (1, 64)
        jnp.asarray(w2, jnp.float32),                          # (64, 10)
        jnp.asarray(b2, jnp.float32).reshape(1, NUM_CLASSES),  # (1, 10)
    )


def fully_connected_forward(x, params, *, tm=512):
    """x: any shape whose trailing dims flatten to 784 (e.g. (B, 1, 28, 28)),
    streamed in its incoming dtype (no wrapper-side cast). `params` comes from
    prepare_params(). Returns (B, 10) float32 logits."""
    w1, b1_2d, w2, b2_2d = params
    x2d = x.reshape(-1, NUM_INPUT)
    batch = x2d.shape[0]
    xb = jnp.dtype(x2d.dtype).itemsize

    # Sublane granularity of the batch tile follows x's packing
    # (8 rows / vreg for 32-bit, 16 for 16-bit, 32 for 8-bit dtypes).
    gran = max(8, 32 // xb)

    # Large tiles amortize the ~0.35 us per-grid-step overhead (HBM-bound on the
    # x stream), but cap so large batches still produce >= 4 grid steps: v7x
    # shards the "parallel" axis across its 2 TensorCores.
    tm_eff = min(_round_up(max(tm, gran), gran), _round_up(pl.cdiv(batch, 4), gran))
    tm_eff = max(tm_eff, gran)
    grid = (pl.cdiv(batch, tm_eff),)   # ragged last block: no jnp.pad pass over x

    # Resident-parameter bytes (single copy; BlockSpec may double-buffer them,
    # so count twice for the VMEM estimate).
    param_bytes = (NUM_INPUT * NUM_HIDDEN * jnp.dtype(w1.dtype).itemsize
                   + NUM_HIDDEN * 4
                   + NUM_HIDDEN * NUM_CLASSES * 4
                   + NUM_CLASSES * 4)
    vmem_est = (2 * tm_eff * NUM_INPUT * xb          # double-buffered x tiles
                + 2 * tm_eff * NUM_CLASSES * 4       # double-buffered output tiles
                + 2 * param_bytes)
    # Only override the scoped-VMEM limit when v5e's 16 MiB default is at risk
    # (not the case at the default tile sizes).
    vmem_limit = int(min(64 << 20, vmem_est + (4 << 20))) if vmem_est > (12 << 20) else None

    cost_estimate = pl.CostEstimate(
        flops=2 * batch * (NUM_INPUT * NUM_HIDDEN + NUM_HIDDEN * NUM_CLASSES),
        transcendentals=0,
        bytes_accessed=(batch * NUM_INPUT * xb            # x stream (dominant)
                        + param_bytes                     # resident params
                        + batch * NUM_CLASSES * 4),       # output writeback
    )

    return pl.pallas_call(
        _mlp_kernel,
        out_shape=jax.ShapeDtypeStruct((batch, NUM_CLASSES), jnp.float32),
        grid=grid,
        in_specs=[
            pl.BlockSpec((tm_eff, NUM_INPUT), lambda i: (i, 0)),        # x: batch-tiled stream
            pl.BlockSpec((NUM_INPUT, NUM_HIDDEN), lambda i: (0, 0)),    # w1: VMEM-resident
            pl.BlockSpec((1, NUM_HIDDEN), lambda i: (0, 0)),            # b1: resident
            pl.BlockSpec((NUM_HIDDEN, NUM_CLASSES), lambda i: (0, 0)),  # w2: resident
            pl.BlockSpec((1, NUM_CLASSES), lambda i: (0, 0)),           # b2: resident
        ],
        out_specs=pl.BlockSpec((tm_eff, NUM_CLASSES), lambda i: (i, 0)),
        compiler_params=pltpu.CompilerParams(
            dimension_semantics=("parallel",),
            vmem_limit_bytes=vmem_limit,
        ),
        cost_estimate=cost_estimate,
    )(x2d, w1, b1_2d, w2, b2_2d)


def init_params(key):
    """Deterministic init matching PyTorch nn.Linear default U[-1/sqrt(fan_in), +1/sqrt(fan_in)].
    Weights stored as (in, out) — transpose of PyTorch's (out, in) layout."""
    k1, k2, k3, k4 = jax.random.split(key, 4)
    bound1 = 1.0 / jnp.sqrt(NUM_INPUT)
    bound2 = 1.0 / jnp.sqrt(NUM_HIDDEN)
    w1 = jax.random.uniform(k1, (NUM_INPUT, NUM_HIDDEN), jnp.float32, -bound1, bound1)
    b1 = jax.random.uniform(k2, (NUM_HIDDEN,), jnp.float32, -bound1, bound1)
    w2 = jax.random.uniform(k3, (NUM_HIDDEN, NUM_CLASSES), jnp.float32, -bound2, bound2)
    b2 = jax.random.uniform(k4, (NUM_CLASSES,), jnp.float32, -bound2, bound2)
    return w1, b1, w2, b2


def _reference(x, w1, b1, w2, b2):
    x2d = x.reshape(-1, NUM_INPUT).astype(jnp.float32)
    return jnp.maximum(x2d @ w1 + b1, 0.0) @ w2 + b2


if __name__ == "__main__":
    key = jax.random.PRNGKey(0)
    k_x, k_x2, k_p = jax.random.split(key, 3)
    w1, b1, w2, b2 = init_params(k_p)
    params_f32 = prepare_params(w1, b1, w2, b2)   # prepared ONCE, reused per forward

    # Small serving-style batch (MNIST-style NCHW input, like the PyTorch module).
    batch = 8
    x = jax.random.normal(k_x, (batch, 1, 28, 28), dtype=jnp.float32)
    out = jax.block_until_ready(fully_connected_forward(x, params_f32))
    assert out.shape == (batch, NUM_CLASSES)
    ref = _reference(x, w1, b1, w2, b2)
    assert jnp.allclose(out, ref, atol=1e-5, rtol=1e-5), "f32 small-batch mismatch"

    # Larger batch not divisible by the tile: exercises the ragged boundary block
    # (no jnp.pad pass over x) and a multi-step grid with resident weights.
    batch2 = 272
    x2 = jax.random.normal(k_x2, (batch2, 1, 28, 28), dtype=jnp.float32)
    out2 = jax.block_until_ready(fully_connected_forward(x2, params_f32))
    ref2 = _reference(x2, w1, b1, w2, b2)
    assert out2.shape == (batch2, NUM_CLASSES)
    assert jnp.allclose(out2, ref2, atol=1e-5, rtol=1e-5), "f32 tiled-batch mismatch"

    # Natively-bf16 activations (stand-in for an upstream bf16 producer): the
    # kernel streams bf16 x directly — no wrapper cast, params prepared once in bf16.
    x2_bf16 = x2.astype(jnp.bfloat16)
    params_bf16 = prepare_params(w1, b1, w2, b2, dtype=jnp.bfloat16)
    out_bf16 = jax.block_until_ready(fully_connected_forward(x2_bf16, params_bf16))
    assert out_bf16.shape == (batch2, NUM_CLASSES)
    assert jnp.allclose(out_bf16, ref2, atol=1e-1, rtol=5e-2), "bf16 path mismatch"

    print("KERNEL_OK")
</pallas_src>

<mosaic_0001>
module attributes {stable_mosaic.version = 11 : i64} {
  func.func @_mlp_kernel(%arg0: i32, %arg1: memref<8x784xf32, #tpu.memory_space<vmem>>, %arg2: memref<784x64xf32, #tpu.memory_space<vmem>>, %arg3: memref<1x64xf32, #tpu.memory_space<vmem>>, %arg4: memref<64x10xf32, #tpu.memory_space<vmem>>, %arg5: memref<1x10xf32, #tpu.memory_space<vmem>>, %arg6: memref<8x10xf32, #tpu.memory_space<vmem>>) attributes {dimension_semantics = [#tpu.dimension_semantics<parallel>], iteration_bounds = array<i64: 1>, scalar_prefetch = 0 : i64, scratch_operands = 0 : i64, tpu.core_type = #tpu.core_type<tc>, window_params = [{transform_indices = @transform_0, window_bounds = array<i64: 8, 784>}, {pipeline_mode = #tpu.pipeline_mode<synchronous>, transform_indices = @transform_1, window_bounds = array<i64: 784, 64>}, {pipeline_mode = #tpu.pipeline_mode<synchronous>, transform_indices = @transform_2, window_bounds = array<i64: 1, 64>}, {pipeline_mode = #tpu.pipeline_mode<synchronous>, transform_indices = @transform_3, window_bounds = array<i64: 64, 10>}, {pipeline_mode = #tpu.pipeline_mode<synchronous>, transform_indices = @transform_4, window_bounds = array<i64: 1, 10>}, {transform_indices = @transform_5, window_bounds = array<i64: 8, 10>}]} {
    %c0 = arith.constant 0 : index
    %c0_0 = arith.constant 0 : index
    %0 = vector.load %arg1[%c0, %c0_0] : memref<8x784xf32, #tpu.memory_space<vmem>>, vector<8x784xf32>
    %c0_1 = arith.constant 0 : index
    %c0_2 = arith.constant 0 : index
    %1 = vector.load %arg2[%c0_1, %c0_2] : memref<784x64xf32, #tpu.memory_space<vmem>>, vector<784x64xf32>
    %cst = arith.constant dense<0.000000e+00> : vector<8x64xf32>
    %2 = tpu.matmul %0, %1, %cst {dimension_numbers = #tpu.dot_dimension_numbers<[1], [0], [0], [1], [0, 0, 1, 1], [], []>} : vector<8x784xf32>, vector<784x64xf32>, vector<8x64xf32> -> vector<8x64xf32>
    %c0_3 = arith.constant 0 : index
    %c0_4 = arith.constant 0 : index
    %3 = vector.load %arg3[%c0_3, %c0_4] : memref<1x64xf32, #tpu.memory_space<vmem>>, vector<1x64xf32>
    %4 = vector.broadcast %3 : vector<1x64xf32> to vector<8x64xf32>
    %5 = arith.addf %2, %4 : vector<8x64xf32>
    %cst_5 = arith.constant 0.000000e+00 : f32
    %6 = vector.broadcast %cst_5 : f32 to vector<8x64xf32>
    %7 = arith.maximumf %5, %6 : vector<8x64xf32>
    %c0_6 = arith.constant 0 : index
    %c0_7 = arith.constant 0 : index
    %8 = vector.load %arg4[%c0_6, %c0_7] : memref<64x10xf32, #tpu.memory_space<vmem>>, vector<64x10xf32>
    %cst_8 = arith.constant dense<0.000000e+00> : vector<8x10xf32>
    %9 = tpu.matmul %7, %8, %cst_8 {dimension_numbers = #tpu.dot_dimension_numbers<[1], [0], [0], [1], [0, 0, 1, 1], [], []>} : vector<8x64xf32>, vector<64x10xf32>, vector<8x10xf32> -> vector<8x10xf32>
    %c0_9 = arith.constant 0 : index
    %c0_10 = arith.constant 0 : index
    %10 = vector.load %arg5[%c0_9, %c0_10] : memref<1x10xf32, #tpu.memory_space<vmem>>, vector<1x10xf32>
    %11 = vector.broadcast %10 : vector<1x10xf32> to vector<8x10xf32>
    %12 = arith.addf %9, %11 : vector<8x10xf32>
    %c0_11 = arith.constant 0 : index
    %c0_12 = arith.constant 0 : index
    %13 = vector.load %arg6[%c0_11, %c0_12] : memref<8x10xf32, #tpu.memory_space<vmem>>, vector<8x10xf32>
    tpu.vector_store %arg6[%c0_11, %c0_12], %12 {strides = array<i32>} : memref<8x10xf32, #tpu.memory_space<vmem>>, vector<8x10xf32>,
    return
  }
  func.func @transform_0(%arg0: i32) -> (i32, i32) {
    %c0_i32 = arith.constant 0 : i32
    %c0_i32_0 = arith.constant 0 : i32
    return %arg0, %c0_i32 : i32, i32
  }
  func.func @transform_1(%arg0: i32) -> (i32, i32) {
    %c0_i32 = arith.constant 0 : i32
    %c0_i32_0 = arith.constant 0 : i32
    %c0_i32_1 = arith.constant 0 : i32
    return %c0_i32, %c0_i32_0 : i32, i32
  }
  func.func @transform_2(%arg0: i32) -> (i32, i32) {
    %c0_i32 = arith.constant 0 : i32
    %c0_i32_0 = arith.constant 0 : i32
    %c0_i32_1 = arith.constant 0 : i32
    return %c0_i32, %c0_i32_0 : i32, i32
  }
  func.func @transform_3(%arg0: i32) -> (i32, i32) {
    %c0_i32 = arith.constant 0 : i32
    %c0_i32_0 = arith.constant 0 : i32
    %c0_i32_1 = arith.constant 0 : i32
    return %c0_i32, %c0_i32_0 : i32, i32
  }
  func.func @transform_4(%arg0: i32) -> (i32, i32) {
    %c0_i32 = arith.constant 0 : i32
    %c0_i32_0 = arith.constant 0 : i32
    %c0_i32_1 = arith.constant 0 : i32
    return %c0_i32, %c0_i32_0 : i32, i32
  }
  func.func @transform_5(%arg0: i32) -> (i32, i32) {
    %c0_i32 = arith.constant 0 : i32
    %c0_i32_0 = arith.constant 0 : i32
    return %arg0, %c0_i32 : i32, i32
  }
}

</mosaic_0001>

<bundles_post_ra>
// kernel: tpu_custom_call.1
= control target key start
LH: loop header
LB: loop body
LE: loop exit
PB: predicated region body
PF: predicated region fallthrough
CT: control target
= control target key end

     0   :  { %s739_s0 = inlined_call_operand.vmem [shape: f32[8,784], index: 0, kind: input, shape index: {}]   ;;  %s740_s1 = inlined_call_operand.vmem [shape: f32[784,64], index: 1, kind: input, shape index: {}]   ;;  %s741_s2 = inlined_call_operand.vmem [shape: f32[1,64], index: 2, kind: input, shape index: {}]   ;;  %s742_s3 = inlined_call_operand.vmem [shape: f32[64,10], index: 3, kind: input, shape index: {}]   ;;  %s743_s4 = inlined_call_operand.vmem [shape: f32[1,10], index: 4, kind: input, shape index: {}]   ;;  %s744_s5 = inlined_call_operand.hbm [shape: f32[8,10], index: 5, kind: output, shape index: {}]  }
   0x1   :  { %v43_v0 = vld [vmem:[%s740_s1 + $0x78] sm:$0xff]  ;;  %v42_v1 = vld [vmem:[%s740_s1 + $0x70] sm:$0xff]  ;;  %v41_v4 = vld [vmem:[%s740_s1 + $0x68] sm:$0xff] }
   0x2   :  { %v59_v2 = vld [vmem:[%s740_s1 + $0xf8] sm:$0xff]  ;;  %134 = vmatpush.msra.mxu0 %v43_v0  ;;  %v58_v3 = vld [vmem:[%s740_s1 + $0xf0] sm:$0xff]  ;;  %v57_v5 = vld [vmem:[%s740_s1 + $0xe8] sm:$0xff] }
   0x3   :  { %154 = vmatpush.msra.mxu1 %v59_v2  ;;  %v40_v6 = vld [vmem:[%s740_s1 + $0x60] sm:$0xff]  ;;  %v39_v8 = vld [vmem:[%s740_s1 + $0x58] sm:$0xff]  ;;  %v38_v10 = vld [vmem:[%s740_s1 + $0x50] sm:$0xff] }
   0x4   :  { %135 = vmatpush.msra.mxu0 %v42_v1  ;;  %v56_v7 = vld [vmem:[%s740_s1 + $0xe0] sm:$0xff]  ;;  %v55_v9 = vld [vmem:[%s740_s1 + $0xd8] sm:$0xff]  ;;  %v54_v12 = vld [vmem:[%s740_s1 + $0xd0] sm:$0xff] }
   0x5   :  { %155 = vmatpush.msra.mxu1 %v58_v3  ;;  %v75_v11 = vld [vmem:[%s740_s1 + $0x178] sm:$0xff]  ;;  %v74_v13 = vld [vmem:[%s740_s1 + $0x170] sm:$0xff]  ;;  %v73_v15 = vld [vmem:[%s740_s1 + $0x168] sm:$0xff] }
   0x6   :  { %136 = vmatpush.msra.mxu0 %v41_v4  ;;  %174 = vmatpush.msra.mxu2 %v75_v11  ;;  %v91_v14 = vld [vmem:[%s740_s1 + $0x1f8] sm:$0xff]  ;;  %v90_v16 = vld [vmem:[%s740_s1 + $0x1f0] sm:$0xff]  ;;  %v37_v17 = vld [vmem:[%s740_s1 + $0x48] sm:$0xff] }
   0x7   :  { %156 = vmatpush.msra.mxu1 %v57_v5  ;;  %v53_v18 = vld [vmem:[%s740_s1 + $0xc8] sm:$0xff]  ;;  %194 = vmatpush.msra.mxu3 %v91_v14  ;;  %v72_v19 = vld [vmem:[%s740_s1 + $0x160] sm:$0xff]  ;;  %v71_v23 = vld [vmem:[%s740_s1 + $0x158] sm:$0xff] }
   0x8   :  { %137 = vmatpush.msra.mxu0 %v40_v6  ;;  %175 = vmatpush.msra.mxu2 %v74_v13  ;;  %v89_v20 = vld [vmem:[%s740_s1 + $0x1e8] sm:$0xff]  ;;  %v36_v21 = vld [vmem:[%s740_s1 + $0x40] sm:$0xff]  ;;  %v35_v25 = vld [vmem:[%s740_s1 + $0x38] sm:$0xff] }
   0x9   :  { %157 = vmatpush.msra.mxu1 %v56_v7  ;;  %v52_v22 = vld [vmem:[%s740_s1 + $0xc0] sm:$0xff]  ;;  %195 = vmatpush.msra.mxu3 %v90_v16  ;;  %v51_v26 = vld [vmem:[%s740_s1 + $0xb8] sm:$0xff]  ;;  %v70_v27 = vld [vmem:[%s740_s1 + $0x150] sm:$0xff] }
   0xa   :  { %138 = vmatpush.msra.mxu0 %v39_v8  ;;  %176 = vmatpush.msra.mxu2 %v73_v15  ;;  %v88_v24 = vld [vmem:[%s740_s1 + $0x1e0] sm:$0xff]  ;;  %v87_v28 = vld [vmem:[%s740_s1 + $0x1d8] sm:$0xff]  ;;  %v34_v29 = vld [vmem:[%s740_s1 + $0x30] sm:$0xff] }
   0xb   :  { %158 = vmatpush.msra.mxu1 %v55_v9  ;;  %196 = vmatpush.msra.mxu3 %v89_v20  ;;  %v50_v30 = vld [vmem:[%s740_s1 + $0xb0] sm:$0xff]  ;;  %v69_v31 = vld [vmem:[%s740_s1 + $0x148] sm:$0xff]  ;;  %v68_v35 = vld [vmem:[%s740_s1 + $0x140] sm:$0xff] }
   0xc   :  { %139 = vmatpush.msra.mxu0 %v38_v10  ;;  %177 = vmatpush.msra.mxu2 %v72_v19  ;;  %v86_v32 = vld [vmem:[%s740_s1 + $0x1d0] sm:$0xff]  ;;  %v33_v33 = vld [vmem:[%s740_s1 + $0x28] sm:$0xff]  ;;  %v32_v37 = vld [vmem:[%s740_s1 + $0x20] sm:$0xff] }
   0xd   :  { %159 = vmatpush.msra.mxu1 %v54_v12  ;;  %197 = vmatpush.msra.mxu3 %v88_v24  ;;  %v49_v34 = vld [vmem:[%s740_s1 + $0xa8] sm:$0xff]  ;;  %v48_v38 = vld [vmem:[%s740_s1 + $0xa0] sm:$0xff]  ;;  %v67_v39 = vld [vmem:[%s740_s1 + $0x138] sm:$0xff] }
   0xe   :  { %140 = vmatpush.msra.mxu0 %v37_v17  ;;  %178 = vmatpush.msra.mxu2 %v71_v23  ;;  %v85_v36 = vld [vmem:[%s740_s1 + $0x1c8] sm:$0xff]  ;;  %v84_v40 = vld [vmem:[%s740_s1 + $0x1c0] sm:$0xff]  ;;  %v31_v41 = vld [vmem:[%s740_s1 + $0x18] sm:$0xff] }
   0xf   :  { %160 = vmatpush.msra.mxu1 %v53_v18  ;;  %198 = vmatpush.msra.mxu3 %v87_v28  ;;  %v47_v42 = vld [vmem:[%s740_s1 + $0x98] sm:$0xff]  ;;  %v66_v43 = vld [vmem:[%s740_s1 + $0x130] sm:$0xff]  ;;  %v65_v47 = vld [vmem:[%s740_s1 + $0x128] sm:$0xff] }
  0x10   :  { %141 = vmatpush.msra.mxu0 %v36_v21  ;;  %179 = vmatpush.msra.mxu2 %v70_v27  ;;  %v83_v44 = vld [vmem:[%s740_s1 + $0x1b8] sm:$0xff]  ;;  %v30_v45 = vld [vmem:[%s740_s1 + $0x10] sm:$0xff]  ;;  %v29_v49 = vld [vmem:[%s740_s1 + $0x8] sm:$0xff] }
  0x11   :  { %161 = vmatpush.msra.mxu1 %v52_v22  ;;  %199 = vmatpush.msra.mxu3 %v86_v32  ;;  %v46_v46 = vld [vmem:[%s740_s1 + $0x90] sm:$0xff]  ;;  %v45_v50 = vld [vmem:[%s740_s1 + $0x88] sm:$0xff]  ;;  %v64_v51 = vld [vmem:[%s740_s1 + $0x120] sm:$0xff] }
  0x12   :  { %142 = vmatpush.msra.mxu0 %v35_v25  ;;  %180 = vmatpush.msra.mxu2 %v69_v31  ;;  %v82_v48 = vld [vmem:[%s740_s1 + $0x1b0] sm:$0xff]  ;;  %v81_v52 = vld [vmem:[%s740_s1 + $0x1a8] sm:$0xff]  ;;  %v28_v53 = vld [vmem:[%s740_s1] sm:$0xff] }
  0x13   :  { %162 = vmatpush.msra.mxu1 %v51_v26  ;;  %200 = vmatpush.msra.mxu3 %v85_v36  ;;  %v44_v54 = vld [vmem:[%s740_s1 + $0x80] sm:$0xff]  ;;  %v107_v55 = vld [vmem:[%s740_s1 + $0x278] sm:$0xff]  ;;  %v106_v59 = vld [vmem:[%s740_s1 + $0x270] sm:$0xff] }
  0x14   :  { %143 = vmatpush.msra.mxu0 %v34_v29  ;;  %181 = vmatpush.msra.mxu2 %v68_v35  ;;  %v123_v56 = vld [vmem:[%s740_s1 + $0x2f8] sm:$0xff]  ;;  %v80_v58 = vld [vmem:[%s740_s1 + $0x1a0] sm:$0xff]  ;;  %v122_v60 = vld [vmem:[%s740_s1 + $0x2f0] sm:$0xff] }
  0x15   :  { %163 = vmatpush.msra.mxu1 %v50_v30  ;;  %201 = vmatpush.msra.mxu3 %v84_v40  ;;  %v63_v57 = vld [vmem:[%s740_s1 + $0x118] sm:$0xff]  ;;  %v62_v61 = vld [vmem:[%s740_s1 + $0x110] sm:$0xff]  ;;  %v105_v63 = vld [vmem:[%s740_s1 + $0x268] sm:$0xff] }
  0x16   :  { %144 = vmatpush.msra.mxu0 %v33_v33  ;;  %182 = vmatpush.msra.mxu2 %v67_v39  ;;  %v79_v62 = vld [vmem:[%s740_s1 + $0x198] sm:$0xff]  ;;  %v121_v0 = vld [vmem:[%s740_s1 + $0x2e8] sm:$0xff]  ;;  %v104_v1 = vld [vmem:[%s740_s1 + $0x260] sm:$0xff] }
  0x17   :  { %164 = vmatpush.msra.mxu1 %v49_v34  ;;  %202 = vmatpush.msra.mxu3 %v83_v44  ;;  %v61_v2 = vld [vmem:[%s740_s1 + $0x108] sm:$0xff]  ;;  %v78_v3 = vld [vmem:[%s740_s1 + $0x190] sm:$0xff]  ;;  %v120_v4 = vld [vmem:[%s740_s1 + $0x2e0] sm:$0xff] }
  0x18   :  { %145 = vmatpush.msra.mxu0 %v32_v37  ;;  %183 = vmatpush.msra.mxu2 %v66_v43  ;;  %v60_v5 = vld [vmem:[%s740_s1 + $0x100] sm:$0xff]  ;;  %v77_v6 = vld [vmem:[%s740_s1 + $0x188] sm:$0xff] }
  0x19   :  { %165 = vmatpush.msra.mxu1 %v48_v38  ;;  %203 = vmatpush.msra.mxu3 %v82_v48 }
  0x1a   :  { %146 = vmatpush.msra.mxu0 %v31_v41  ;;  %184 = vmatpush.msra.mxu2 %v65_v47 }
  0x1b   :  { %166 = vmatpush.msra.mxu1 %v47_v42  ;;  %204 = vmatpush.msra.mxu3 %v81_v52 }
  0x1c   :  { %147 = vmatpush.msra.mxu0 %v30_v45  ;;  %185 = vmatpush.msra.mxu2 %v64_v51 }
  0x1d   :  { %167 = vmatpush.msra.mxu1 %v46_v46  ;;  %205 = vmatpush.msra.mxu3 %v80_v58 }
  0x1e   :  { %148 = vmatpush.msra.mxu0 %v29_v49  ;;  %186 = vmatpush.msra.mxu2 %v63_v57 }
  0x1f   :  { %168 = vmatpush.msra.mxu1 %v45_v50  ;;  %206 = vmatpush.msra.mxu3 %v79_v62 }
  0x20   :  { %149 = vmatpush.msra.mxu0 %v28_v53  ;;  %187 = vmatpush.msra.mxu2 %v62_v61 }
  0x21   :  { %169 = vmatpush.msra.mxu1 %v44_v54 }
  0x22   :  { %214 = vmatpush.msrb.mxu0 %v107_v55 }
  0x23   :  { %234 = vmatpush.msrb.mxu1 %v123_v56 }
  0x24   :  { %215 = vmatpush.msrb.mxu0 %v106_v59 }
  0x25   :  { %235 = vmatpush.msrb.mxu1 %v122_v60 }
  0x26   :  { %216 = vmatpush.msrb.mxu0 %v105_v63 }
  0x27   :  { %236 = vmatpush.msrb.mxu1 %v121_v0 }
  0x28   :  { %10 = vsyncpa [#allocation3], 0  ;;  %v103_v7 = vld [vmem:[%s740_s1 + $0x258] sm:$0xff]  ;;  %188 = vmatpush.msra.mxu2 %v61_v2  ;;  %207 = vmatpush.msra.mxu3 %v78_v3  ;;  %v23_v9 = vld [vmem:[%s739_s0 + $0x10] sm:$0xff]  ;;  %vm130_vm0 = vcmask 130048   ;;  %vm287_vm1 = vcmask 523264  }
  0x29   :  { %v119_v8 = vld [vmem:[%s740_s1 + $0x2d8] sm:$0xff]  ;;  %217 = vmatpush.msrb.mxu0 %v104_v1  ;;  %237 = vmatpush.msrb.mxu1 %v120_v4  ;;  %v76_v10 = vld [vmem:[%s740_s1 + $0x180] sm:$0xff]  ;;  %v102_v11 = vld [vmem:[%s740_s1 + $0x250] sm:$0xff]  ;;  %s320_s23 = sshll.u32 %s744_s5, 4  ;;  %vm311_vm2 = vcmask 80896   ;;  %s321_s23 = int_to_ptr.hbm [resolvable:$true] %s320_s23 }
  0x2a   :  { %v118_v12 = vld [vmem:[%s740_s1 + $0x2d0] sm:$0xff]  ;;  %189 = vmatpush.msra.mxu2 %v60_v5  ;;  %208 = vmatpush.msra.mxu3 %v77_v6  ;;  %v125_v13 = vld [vmem:[%s740_s1 + $0x308] sm:$0xff]  ;;  %v21_v14 = vld [vmem:[%s739_s0] sm:$0xff] }
  0x2b   :  { %218 = vmatpush.msrb.mxu0 %v103_v7  ;;  %238 = vmatpush.msrb.mxu1 %v119_v8  ;;  %v101_v15 = vld [vmem:[%s740_s1 + $0x248] sm:$0xff]  ;;  %v24_v17 = vld [vmem:[%s739_s0 + $0x18] sm:$0xff]  ;;  %v100_v19 = vld [vmem:[%s740_s1 + $0x240] sm:$0xff] }
  0x2c   :  { %v117_v16 = vld [vmem:[%s740_s1 + $0x2c8] sm:$0xff]  ;;  %190 = vmatmul.f32.vlgmr.msra.gmra.mxu2 %v23_v9  ;;  %209 = vmatpush.msra.mxu3 %v76_v10  ;;  %v116_v20 = vld [vmem:[%s740_s1 + $0x2c0] sm:$0xff]  ;;  %v99_v22 = vld [vmem:[%s740_s1 + $0x238] sm:$0xff] }
  0x2d   :  { %219 = vmatpush.msrb.mxu0 %v102_v11  ;;  %239 = vmatpush.msrb.mxu1 %v118_v12  ;;  %v22_v18 = vld [vmem:[%s739_s0 + $0x8] sm:$0xff]  ;;  %v124_v21 = vld [vmem:[%s740_s1 + $0x300] sm:$0xff]  ;;  %v115_v23 = vld [vmem:[%s740_s1 + $0x2b8] sm:$0xff] }
  0x2e   :  { %268 = vmatpush.msrb.mxu2 %v125_v13  ;;  %150 = vmatmul.f32.vlgmr.msra.gmra.mxu0 %v21_v14  ;;  %v27_v24 = vld [vmem:[%s739_s0 + $0x30] sm:$0xff]  ;;  %v97_v27 = vld [vmem:[%s740_s1 + $0x228] sm:$0xff]  ;;  %v96_v29 = vld [vmem:[%s740_s1 + $0x220] sm:$0xff] }
  0x2f   :  { %220 = vmatpush.msrb.mxu0 %v101_v15  ;;  %240 = vmatpush.msrb.mxu1 %v117_v16  ;;  %v98_v25 = vld [vmem:[%s740_s1 + $0x230] sm:$0xff]  ;;  %v113_v28 = vld [vmem:[%s740_s1 + $0x2a8] sm:$0xff]  ;;  %v112_v30 = vld [vmem:[%s740_s1 + $0x2a0] sm:$0xff] }
  0x30   :  { %210 = vmatmul.f32.vlgmr.msra.gmra.mxu3 %v24_v17  ;;  %170 = vmatmul.f32.vlgmr.msra.gmra.mxu1 %v22_v18  ;;  %v114_v26 = vld [vmem:[%s740_s1 + $0x2b0] sm:$0xff]  ;;  %v95_v31 = vld [vmem:[%s740_s1 + $0x218] sm:$0xff]  ;;  %v93_v35 = vld [vmem:[%s740_s1 + $0x208] sm:$0xff] }
  0x31   :  { %221 = vmatpush.msrb.mxu0 %v100_v19  ;;  %241 = vmatpush.msrb.mxu1 %v116_v20  ;;  %v111_v32 = vld [vmem:[%s740_s1 + $0x298] sm:$0xff]  ;;  %v94_v33 = vld [vmem:[%s740_s1 + $0x210] sm:$0xff]  ;;  %v109_v36 = vld [vmem:[%s740_s1 + $0x288] sm:$0xff] }
  0x32   :  { %269 = vmatpush.msrb.mxu2 %v124_v21  ;;  %v110_v34 = vld [vmem:[%s740_s1 + $0x290] sm:$0xff]  ;;  %v92_v37 = vld [vmem:[%s740_s1 + $0x200] sm:$0xff]  ;;  %v26_v40 = vld [vmem:[%s739_s0 + $0x28] sm:$0xff] }
  0x33   :  { %222 = vmatpush.msrb.mxu0 %v99_v22  ;;  %242 = vmatpush.msrb.mxu1 %v115_v23  ;;  %v108_v38 = vld [vmem:[%s740_s1 + $0x280] sm:$0xff]  ;;  %v282_v41 = vld [vmem:[%s742_s3 + $0x38] sm:$0xff]  ;;  %v281_v42 = vld [vmem:[%s742_s3 + $0x30] sm:$0xff] }
  0x34   :  { %329 = vmatmul.msk.f32.vlgmr.msrb.gmra.mxu2 %vm130_vm0, %v27_v24  ;;  %v25_v39 = vld [vmem:[%s739_s0 + $0x20] sm:$0xff]  ;;  %299 = vmatpush.msrb.mxu3 %v282_v41  ;;  %v280_v43 = vld [vmem:[%s742_s3 + $0x28] sm:$0xff]  ;;  %v278_v45 = vld [vmem:[%s742_s3 + $0x18] sm:$0xff] }
  0x35   :  { %223 = vmatpush.msrb.mxu0 %v98_v25  ;;  %243 = vmatpush.msrb.mxu1 %v114_v26  ;;  %v279_v44 = vld [vmem:[%s742_s3 + $0x20] sm:$0xff]  ;;  %v277_v46 = vld [vmem:[%s742_s3 + $0x10] sm:$0xff]  ;;  %v276_v47 = vld [vmem:[%s742_s3 + $0x8] sm:$0xff] }
  0x36   :  { %300 = vmatpush.msrb.mxu3 %v281_v42  ;;  %v275_v48 = vld [vmem:[%s742_s3] sm:$0xff] }
  0x37   :  { %224 = vmatpush.msrb.mxu0 %v97_v27  ;;  %244 = vmatpush.msrb.mxu1 %v113_v28  ;;  %v332_v49 = vld [vmem:[%s741_s2] ss:$0 sm:$0xff]  ;;  %s360_s2 = smov [#allocation2]  }
  0x38   :  { %301 = vmatpush.msrb.mxu3 %v280_v43  ;;  %v333_v1 = vld [vmem:[%s743_s4] ss:$0 sm:$0xff]  ;;  %s318_s20 = sshll.u32 %s360_s2, 4  ;;  %s319_s20 = int_to_ptr.vmem [resolvable:$true] %s318_s20 }
  0x39   :  { %225 = vmatpush.msrb.mxu0 %v96_v29  ;;  %245 = vmatpush.msrb.mxu1 %v112_v30 }
  0x3a   :  { %302 = vmatpush.msrb.mxu3 %v279_v44 }
  0x3b   :  { %226 = vmatpush.msrb.mxu0 %v95_v31  ;;  %246 = vmatpush.msrb.mxu1 %v111_v32 }
  0x3c   :  { %303 = vmatpush.msrb.mxu3 %v278_v45 }
  0x3d   :  { %227 = vmatpush.msrb.mxu0 %v94_v33  ;;  %247 = vmatpush.msrb.mxu1 %v110_v34 }
  0x3e   :  { %304 = vmatpush.msrb.mxu3 %v277_v46 }
  0x3f   :  { %228 = vmatpush.msrb.mxu0 %v93_v35  ;;  %248 = vmatpush.msrb.mxu1 %v109_v36 }
  0x40   :  { %305 = vmatpush.msrb.mxu3 %v276_v47 }
  0x41   :  { %229 = vmatpush.msrb.mxu0 %v92_v37  ;;  %249 = vmatpush.msrb.mxu1 %v108_v38 }
  0x42   :  { %230 = vmatmul.f32.vlgmr.msrb.gmra.mxu0 %v25_v39  ;;  %250 = vmatmul.f32.vlgmr.msrb.gmra.mxu1 %v26_v40 }
  0x43   :  { %306 = vmatpush.msrb.mxu3 %v275_v48 }
  0xab   :  { %v151_v50 = vpop.f32.mrf.mxu0 }
  0xac   :  { %v152_v51 = vadd.f32 %v332_v49, %v151_v50 }
  0xad   :  { %v171_v52 = vpop.f32.mrf.mxu1 }
  0xae   :  { %v172_v53 = vadd.f32 %v171_v52, %v152_v51 }
  0xaf   :  { %v191_v54 = vpop.f32.mrf.mxu2 }
  0xb0   :  { %v192_v55 = vadd.f32 %v191_v54, %v172_v53 }
  0xb3   :  { %v211_v56 = vpop.f32.mrf.mxu3 }
  0xb4   :  { %v212_v57 = vadd.f32 %v211_v56, %v192_v55 }
  0xb7   :  { %v271_v61 = vpop.f32.mrf.mxu2 }
  0xbf   :  { %v231_v58 = vpop.f32.mrf.mxu0  ;;  %v251_v59 = vpop.f32.mrf.mxu1 }
  0xc0   :  { %v232_v60 = vadd.f32 %v231_v58, %v212_v57 }
  0xc2   :  { %v252_v62 = vadd.f32 %v251_v59, %v232_v60 }
  0xc4   :  { %v272_v63 = vadd.f32 %v271_v61, %v252_v62 }
  0xc6   :  { %v274_v0 = vmax.f32 %v272_v63, 0.0 }
  0xc8   :  { %330 = vmatmul.msk.f32.vlgmr.msrb.gmra.mxu3 %vm287_vm1, %v274_v0 }
 0x14b   :  { %v308_v2 = vpop.f32.mrf.mxu3 }
 0x14c   :  { %v309_v3 = vadd.f32 %v333_v1, %v308_v2 }
 0x14e   :  { %312 = vst.msk [vmem:[#allocation2] sm:$0xff] %vm311_vm2, %v309_v3 }
 0x14f   :  { %323 = dma.vmem_to_hbm [thread:$0]  %s319_s20, 128, %s321_s23, [#allocation3]  }
 0x150   :  { %358 = dma.done.wait [#allocation3], 128  }
 0x151   :  { %359 = vsyncadd [#allocation3], 4294967168 }
 0x152   :  { %328 = vsyncpa [#allocation3], 1 }

</bundles_post_ra>
